<compile_context>
chip_gen: v7x
topology: tpu7x:2x2x1
jax: 0.10.0
libtpu: 0.0.40
codegen_flags: <defaults>
</compile_context>

<pallas_src>
import math

import jax
import jax.numpy as jnp
from jax.experimental import pallas as pl
from jax.experimental.pallas import tpu as pltpu


def _round_up(v, m):
    return (v + m - 1) // m * m


def _cdiv(a, b):
    return (a + b - 1) // b


def _vmem_capacity_bytes():
    try:
        return int(pltpu.get_tpu_info().vmem_capacity_bytes)
    except Exception:
        return 64 * 2 ** 20          # conservative fallback (v7x-sized VMEM)


# ----------------------------- Pallas kernels --------------------------------
def _mm_bias_kernel(w_ref, b_ref, x_ref, o_ref):
    # Single K block: no accumulator round-trip, one store per output tile.
    # w_ref: (TM, TK)  b_ref: (TM, 1) f32  x_ref: (TK, TN)  o_ref: (TM, TN) f32
    o_ref[...] = (jnp.dot(w_ref[...], x_ref[...],
                          preferred_element_type=jnp.float32)
                  + b_ref[...]).astype(o_ref.dtype)


def _mm_bias_ktiled_kernel(w_ref, b_ref, x_ref, o_ref, acc_ref):
    # K-tiled reduction (grid axis 3, "arbitrary"), f32 VMEM accumulator.
    k = pl.program_id(3)

    @pl.when(k == 0)
    def _init():
        # Seed the accumulator with the bias -> no extra VPU add in the epilogue.
        acc_ref[...] = jnp.broadcast_to(b_ref[...], acc_ref.shape)

    acc_ref[...] += jnp.dot(w_ref[...], x_ref[...],
                            preferred_element_type=jnp.float32)

    @pl.when(k == pl.num_programs(3) - 1)
    def _fin():
        o_ref[...] = acc_ref[...].astype(o_ref.dtype)


# --------------------------- tile geometry ------------------------------------
def _conv_matmul_geometry(OC, CKK, L, B, compute_dtype):
    sub = 16 if jnp.dtype(compute_dtype).itemsize == 2 else 8
    cap = _vmem_capacity_bytes()
    big_vmem = cap >= 100 * 2 ** 20          # v5e / v6e (128 MiB VMEM)
    max_tn = 2048 if big_vmem else 1024
    single_k_max = 8192 if big_vmem else 4096
    max_tm = 256

    # M (out-channels): balanced tiles, sublane aligned, bounded by max_tm.
    m_tiles = _cdiv(OC, max_tm)
    TM = _round_up(_cdiv(OC, m_tiles), sub)
    Mp = m_tiles * TM

    # N (sampled output positions): balanced tiles, lane aligned (128).
    n_tiles = _cdiv(L, max_tn)
    if B * m_tiles * n_tiles == 1 and L > 128:
        n_tiles = 2                          # >=2 parallel blocks for v7x's 2 TCs
    TN = _round_up(_cdiv(L, n_tiles), 128)
    Np = n_tiles * TN

    # K (contraction = C*kh*kw).
    if CKK <= single_k_max:
        k_tiles = 1
        # Full-dim block. Align to 128 when CKK is large enough that the zero
        # padding does not inflate x_col's HBM footprint; keep bf16 sublane
        # alignment otherwise (memory-bound on x_col dominates for small CKK).
        TK = _round_up(CKK, 128) if CKK >= 128 else _round_up(CKK, sub)
        CKKp = TK
    else:
        base_tk = 512                        # multiple of 256 (v6e/v7x MXU) and 128 (v5e)
        k_tiles = _cdiv(CKK, base_tk)
        TK = _round_up(_cdiv(CKK, k_tiles), 256)
        CKKp = k_tiles * TK

    return dict(TM=TM, Mp=Mp, m_tiles=m_tiles, TN=TN, Np=Np, n_tiles=n_tiles,
                TK=TK, CKKp=CKKp, k_tiles=k_tiles, vmem_cap=cap)


# ----------------------------- pallas wrapper ---------------------------------
def _pallas_matmul_bias(w_flat, bias, x_col, geom, compute_dtype):
    """out[b, oc, n] = sum_j w_flat[oc, j] * x_col[b, j, n] + bias[oc] (f32 acc)."""
    OC, CKK = w_flat.shape
    B, CKKp, Np = x_col.shape
    TM, Mp, m_tiles = geom["TM"], geom["Mp"], geom["m_tiles"]
    TK, k_tiles = geom["TK"], geom["k_tiles"]
    TN, n_tiles = geom["TN"], geom["n_tiles"]
    assert CKKp == geom["CKKp"] and Np == geom["Np"]

    itemsize = jnp.dtype(compute_dtype).itemsize
    w_p = jnp.pad(w_flat.astype(compute_dtype), ((0, Mp - OC), (0, CKKp - CKK)))
    b_p = jnp.pad(bias.astype(jnp.float32), (0, Mp - OC)).reshape(Mp, 1)

    if k_tiles == 1:
        grid = (B, m_tiles, n_tiles)
        in_specs = [
            pl.BlockSpec((TM, TK), lambda b, m, n: (m, 0)),          # weight
            pl.BlockSpec((TM, 1), lambda b, m, n: (m, 0)),           # bias
            pl.BlockSpec((None, TK, TN), lambda b, m, n: (b, 0, n)), # sampled im2col
        ]
        out_specs = pl.BlockSpec((None, TM, TN), lambda b, m, n: (b, m, n))
        scratch = []
        kernel = _mm_bias_kernel
        semantics = ("parallel", "parallel", "parallel")
    else:
        grid = (B, m_tiles, n_tiles, k_tiles)                        # reduction last
        in_specs = [
            pl.BlockSpec((TM, TK), lambda b, m, n, k: (m, k)),
            pl.BlockSpec((TM, 1), lambda b, m, n, k: (m, 0)),
            pl.BlockSpec((None, TK, TN), lambda b, m, n, k: (b, k, n)),
        ]
        out_specs = pl.BlockSpec((None, TM, TN), lambda b, m, n, k: (b, m, n))
        scratch = [pltpu.VMEM((TM, TN), jnp.float32)]
        kernel = _mm_bias_ktiled_kernel
        semantics = ("parallel", "parallel", "parallel", "arbitrary")

    # VMEM budget: double-buffered ins/outs (+ lane-padded bias tile) + accumulator.
    vmem_est = (2 * TM * TK * itemsize            # weight
                + 2 * TK * TN * itemsize          # x tile
                + 2 * TM * 128 * 4                # bias (lane-padded)
                + 2 * TM * TN * 4                 # output tile (f32)
                + (TM * TN * 4 if k_tiles > 1 else 0))
    cap_limit = min(geom["vmem_cap"] * 3 // 4, 100 * 2 ** 20)   # <=48 MiB on v7x
    vmem_limit = int(min(cap_limit, max(2 * vmem_est, 16 * 2 ** 20)))

    cost = pl.CostEstimate(
        flops=2 * B * Mp * CKKp * Np + B * Mp * Np,
        transcendentals=0,
        bytes_accessed=(Mp * CKKp * itemsize + B * CKKp * Np * itemsize
                        + B * Mp * Np * 4 + Mp * 4))

    out_p = pl.pallas_call(
        kernel,
        out_shape=jax.ShapeDtypeStruct((B, Mp, Np), jnp.float32),
        grid=grid,
        in_specs=in_specs,
        out_specs=out_specs,
        scratch_shapes=scratch,
        compiler_params=pltpu.CompilerParams(
            dimension_semantics=semantics,
            vmem_limit_bytes=vmem_limit),
        cost_estimate=cost,
    )(w_p, b_p, x_col)
    return out_p                                  # (B, Mp, Np) f32


# ------------------------------ JAX glue -------------------------------------
def _sampled_im2col(x, rows, cols, kh, kw, padding, dilation, CKKp, Np, dtype):
    """Gather ONLY the sampled im2col columns directly from the (padded) input,
    batch-major, in compute dtype, already at the kernel's padded geometry.

    x: (B, C, H, W); rows/cols: (L,) window origins in the padded image.
    Returns (B, CKKp, Np) with row order (c, i, j), matching weight.reshape(OC,-1).
    """
    B, C, H, W = x.shape
    xq = x.astype(dtype)
    if padding:
        xq = jnp.pad(xq, ((0, 0), (0, 0), (padding, padding), (padding, padding)))
    L = rows.shape[0]
    if Np > L:
        # Lane-padding columns gather window (0,0): harmless values, the matching
        # output lanes are sliced away after the kernel.
        rows = jnp.pad(rows, (0, Np - L))
        cols = jnp.pad(cols, (0, Np - L))
    pieces = []
    for i in range(kh):
        for j in range(kw):
            pieces.append(xq[:, :, rows + i * dilation, cols + j * dilation])  # (B,C,Np)
    col = jnp.stack(pieces, axis=2).reshape(B, C * kh * kw, Np)
    if CKKp > C * kh * kw:
        # Contraction-dim padding must be zeros (it feeds the MXU accumulate).
        col = jnp.pad(col, ((0, 0), (0, CKKp - C * kh * kw), (0, 0)))
    return col
    # TODO(synk): longer-term, fuse this gather into the Pallas kernel itself
    # (scalar-prefetched rows/cols + manual DMA from x in pl.ANY) so x_col never
    # hits HBM at all.


class SConv2dAvgPallas:
    """Forward-pass reimplementation of SConv2dAvg (default args: index/mask = -1,
    stoch=True): sample() + gather + einsum + bias + reshape."""

    def __init__(self, in_channels, out_channels, kernel_size,
                 stride=1, padding=0, dilation=1, ceil_mode=True, bias=True,
                 compute_dtype=jnp.bfloat16, key=jax.random.PRNGKey(42)):
        self.in_channels = in_channels
        self.out_channels = out_channels
        self.kernel_size = kernel_size
        self.stride = stride
        self.padding = padding
        self.dilation = dilation
        self.ceil_mode = ceil_mode
        # compute_dtype=jnp.float32 is available if the bf16 MXU precision drop
        # (f32-accumulated) is not acceptable.
        self.compute_dtype = compute_dtype
        kw_, kb_ = jax.random.split(key)
        fan_in = in_channels * kernel_size * kernel_size
        bound = 1.0 / math.sqrt(fan_in)   # mimic nn.Conv2d default init
        self.weight = jax.random.uniform(
            kw_, (out_channels, in_channels, kernel_size, kernel_size),
            minval=-bound, maxval=bound, dtype=jnp.float32)
        self.bias = (jax.random.uniform(kb_, (out_channels,), minval=-bound,
                                        maxval=bound, dtype=jnp.float32)
                     if bias else None)
        # TODO(synk): masked-output path (mask != -1: pooldeconv/deconv mask dilation
        # and the scatter into a zero output) is not exercised by the default
        # forward and is not implemented here.

    def get_size(self, in_h, in_w, stride):
        # Mirrors SConv2dAvg.get_size() (which, like the reference, ignores dilation).
        k = self.kernel_size
        afterconv_h = in_h + 2 * self.padding - (k - 1)
        afterconv_w = in_w + 2 * self.padding - (k - 1)
        if self.ceil_mode:
            out_h = math.ceil(afterconv_h / stride)
            out_w = math.ceil(afterconv_w / stride)
        else:
            out_h = math.floor(afterconv_h / stride)
            out_w = math.floor(afterconv_w / stride)
        return afterconv_h, afterconv_w, out_h, out_w

    def sample_index(self, in_h, in_w, stride, rng_key):
        """Mirrors SConv2dAvg.sample() for mask == -1 (flat index into afterconv grid).
        Note: like the reference, both edge corrections are gated on resth != 0."""
        afterconv_h, afterconv_w, out_h, out_w = self.get_size(in_h, in_w, stride)
        sel = jax.random.randint(rng_key, (out_h, out_w), 0, stride * stride,
                                 dtype=jnp.int32)
        resth = out_h * stride - afterconv_h
        restw = out_w * stride - afterconv_w
        if self.ceil_mode and resth != 0:
            sel = sel.at[-1, :].set(sel[-1, :] // stride % (stride - resth) * stride
                                    + sel[-1, :] % stride)
            sel = sel.at[:, -1].set(sel[:, -1] % stride % (stride - restw)
                                    + sel[:, -1] // stride * stride)
        rng = jnp.arange(0, out_h * stride * out_w * stride,
                         stride * stride, dtype=jnp.int32).reshape(out_h, out_w)
        return sel + rng  # (out_h, out_w)

    def __call__(self, x, rng_key, stoch=True, stride=-1):
        if stride == -1:
            stride = self.stride
        if not stoch:
            stride = 1
        B, C, in_h, in_w = x.shape
        OC, _, kh, kw = self.weight.shape
        afterconv_h, afterconv_w, out_h, out_w = self.get_size(in_h, in_w, stride)

        if stride != 1:
            index = self.sample_index(in_h, in_w, stride, rng_key).reshape(-1)  # (L,)
        else:
            index = jnp.arange(afterconv_h * afterconv_w, dtype=jnp.int32)
        # Decompose the flat afterconv index into window origins (same semantics as
        # gathering column `index` of the stride-1 unfold, without materializing it).
        rows = index // afterconv_w
        cols = index % afterconv_w
        # TODO(synk): for dilation != 1 with stride != 1 the PyTorch reference's
        # get_size/sample are inconsistent with Unfold; demo uses dilation == 1.

        L = out_h * out_w
        CKK = C * kh * kw
        geom = _conv_matmul_geometry(OC, CKK, L, B, self.compute_dtype)

        x_col = _sampled_im2col(x, rows, cols, kh, kw, self.padding, self.dilation,
                                geom["CKKp"], geom["Np"], self.compute_dtype)

        w_flat = self.weight.reshape(OC, -1)
        bias = self.bias if self.bias is not None else jnp.zeros((OC,), jnp.float32)

        out_p = _pallas_matmul_bias(w_flat, bias, x_col, geom,
                                    self.compute_dtype)        # (B, Mp, Np) f32
        return out_p[:, :OC, :L].reshape(B, OC, out_h, out_w)


# ------------------------------- main ----------------------------------------
if __name__ == "__main__":
    root = jax.random.PRNGKey(0)
    k_x, k_param, k_sel = jax.random.split(root, 3)

    B, C, H, W = 2, 4, 16, 16
    OC, K, STRIDE = 8, 3, 2

    x = jax.random.normal(k_x, (B, C, H, W), dtype=jnp.float32)

    mod = SConv2dAvgPallas(C, OC, K, stride=STRIDE, padding=0,
                           dilation=1, ceil_mode=True, bias=True,
                           compute_dtype=jnp.bfloat16, key=k_param)

    out = mod(x, rng_key=k_sel, stoch=True)
    out = jax.block_until_ready(out)

    exp_h = math.ceil((H - (K - 1)) / STRIDE)
    exp_w = math.ceil((W - (K - 1)) / STRIDE)
    assert out.shape == (B, OC, exp_h, exp_w), out.shape
    assert bool(jnp.all(jnp.isfinite(out)))

    # Pure-JAX f32 reference of the same forward (sampled gather + matmul + bias).
    index = mod.sample_index(H, W, STRIDE, k_sel).reshape(-1)
    acw = W - (K - 1)
    rows_r, cols_r = index // acw, index % acw
    pieces = []
    for i in range(K):
        for j in range(K):
            pieces.append(x[:, :, rows_r + i, cols_r + j])          # (B, C, L)
    col_ref = jnp.stack(pieces, axis=2).reshape(B, C * K * K, -1)   # (B, CKK, L) f32
    ref = (jnp.einsum('kj,bjl->bkl', mod.weight.reshape(OC, -1), col_ref)
           + mod.bias[None, :, None]).reshape(B, OC, exp_h, exp_w)
    assert bool(jnp.allclose(out, ref, rtol=5e-2, atol=5e-2)), \
        float(jnp.max(jnp.abs(out - ref)))

    print("KERNEL_OK")
</pallas_src>

<mosaic_0001>
module attributes {stable_mosaic.version = 11 : i64} {
  func.func @_mm_bias_kernel(%arg0: i32, %arg1: i32, %arg2: i32, %arg3: memref<16x48xbf16, #tpu.memory_space<vmem>>, %arg4: memref<16x1xf32, #tpu.memory_space<vmem>>, %arg5: memref<1x48x128xbf16, #tpu.memory_space<vmem>>, %arg6: memref<1x16x128xf32, #tpu.memory_space<vmem>>) attributes {dimension_semantics = [#tpu.dimension_semantics<parallel>, #tpu.dimension_semantics<parallel>, #tpu.dimension_semantics<parallel>], iteration_bounds = array<i64: 2, 1, 1>, scalar_prefetch = 0 : i64, scratch_operands = 0 : i64, tpu.core_type = #tpu.core_type<tc>, window_params = [{transform_indices = @transform_0, window_bounds = array<i64: 16, 48>}, {transform_indices = @transform_1, window_bounds = array<i64: 16, 1>}, {transform_indices = @transform_2, window_bounds = array<i64: 1, 48, 128>}, {transform_indices = @transform_3, window_bounds = array<i64: 1, 16, 128>}]} {
    %c0 = arith.constant 0 : index
    %c0_0 = arith.constant 0 : index
    %0 = vector.load %arg3[%c0, %c0_0] : memref<16x48xbf16, #tpu.memory_space<vmem>>, vector<16x48xbf16>
    %c0_1 = arith.constant 0 : index
    %c0_2 = arith.constant 0 : index
    %c0_3 = arith.constant 0 : index
    %1 = vector.load %arg5[%c0_1, %c0_2, %c0_3] : memref<1x48x128xbf16, #tpu.memory_space<vmem>>, vector<1x48x128xbf16>
    %2 = vector.shape_cast %1 : vector<1x48x128xbf16> to vector<48x128xbf16>
    %cst = arith.constant dense<0.000000e+00> : vector<16x128xf32>
    %3 = tpu.matmul %0, %2, %cst {dimension_numbers = #tpu.dot_dimension_numbers<[1], [0], [0], [1], [0, 0, 1, 1], [], []>} : vector<16x48xbf16>, vector<48x128xbf16>, vector<16x128xf32> -> vector<16x128xf32>
    %c0_4 = arith.constant 0 : index
    %c0_5 = arith.constant 0 : index
    %4 = vector.load %arg4[%c0_4, %c0_5] : memref<16x1xf32, #tpu.memory_space<vmem>>, vector<16x1xf32>
    %5 = vector.broadcast %4 : vector<16x1xf32> to vector<16x128xf32>
    %6 = arith.addf %3, %5 : vector<16x128xf32>
    %c0_6 = arith.constant 0 : index
    %c0_7 = arith.constant 0 : index
    %c0_8 = arith.constant 0 : index
    %7 = vector.load %arg6[%c0_6, %c0_7, %c0_8] : memref<1x16x128xf32, #tpu.memory_space<vmem>>, vector<1x16x128xf32>
    %8 = vector.shape_cast %7 : vector<1x16x128xf32> to vector<16x128xf32>
    %9 = vector.shape_cast %6 : vector<16x128xf32> to vector<1x16x128xf32>
    tpu.vector_store %arg6[%c0_6, %c0_7, %c0_8], %9 {strides = array<i32>} : memref<1x16x128xf32, #tpu.memory_space<vmem>>, vector<1x16x128xf32>,
    return
  }
  func.func @transform_0(%arg0: i32, %arg1: i32, %arg2: i32) -> (i32, i32) {
    %c0_i32 = arith.constant 0 : i32
    %c0_i32_0 = arith.constant 0 : i32
    return %arg1, %c0_i32 : i32, i32
  }
  func.func @transform_1(%arg0: i32, %arg1: i32, %arg2: i32) -> (i32, i32) {
    %c0_i32 = arith.constant 0 : i32
    %c0_i32_0 = arith.constant 0 : i32
    return %arg1, %c0_i32 : i32, i32
  }
  func.func @transform_2(%arg0: i32, %arg1: i32, %arg2: i32) -> (i32, i32, i32) {
    %c0_i32 = arith.constant 0 : i32
    %c0_i32_0 = arith.constant 0 : i32
    return %arg0, %c0_i32, %arg2 : i32, i32, i32
  }
  func.func @transform_3(%arg0: i32, %arg1: i32, %arg2: i32) -> (i32, i32, i32) {
    %c0_i32 = arith.constant 0 : i32
    return %arg0, %arg1, %arg2 : i32, i32, i32
  }
}

</mosaic_0001>

<bundles_post_ra>
// kernel: tpu_custom_call.1
= control target key start
LH: loop header
LB: loop body
LE: loop exit
PB: predicated region body
PF: predicated region fallthrough
CT: control target
= control target key end

     0   :  { %8 = vsyncpa [#allocation3], 0  ;;  %s927_s0 = inlined_call_operand.vmem [shape: bf16[16,48], index: 0, kind: input, shape index: {}]   ;;  %s928_s1 = inlined_call_operand.vmem [shape: f32[16,1], index: 1, kind: input, shape index: {}]   ;;  %s929_s2 = inlined_call_operand.hbm [shape: bf16[2,48,128], index: 2, kind: input, shape index: {}]   ;;  %s930_s3 = inlined_call_operand.hbm [shape: f32[2,16,128], index: 3, kind: output, shape index: {}]  }
   0x1   :  { %10 = vsyncpa [#allocation3 + $0x1], 0 }
   0x2   :  { %11 = vsyncpa [#allocation4], 0 }
   0x3   :  { %13 = vsyncpa [#allocation4 + $0x1], 0  ;;  %s742_s12 = smov 0   ;;  %s744_s13 = smov 0  }
   0x4   :  { %s746_s14 = smov 0   ;;  %s748_s15 = smov 0  }
   0x5   :  { %s750_s16 = smov 0   ;;  %s752_s17 = smov 0  }
   0x6 LB: > { %s488_s18 = sadd.s32 4294967295, %s711_s17   ;;  %s489_s19 = sadd.s32 4294967294, %s711_s17   ;;  %s711_s17 = sphi %s752_s17, %s19_s17   ;;  %s707_s16 = sphi %s750_s16, %s945_s16   ;;  %s703_s15 = sphi %s748_s15, %s944_s15   ;;  %s699_s14 = sphi %s746_s14, %s943_s14   ;;  %s695_s13 = sphi %s744_s13, %s942_s13   ;;  %s691_s12 = sphi %s742_s12, %s941_s12  }
   0x7   : > { %s38_s20 = sadd.s32 1, %s707_s16  ;;  %s99_s21 = sadd.s32 1, %s699_s14 }
   0x8   : > { %p40_p0 = scmp.ge.s32.totalorder %s38_s20, 2  ;;  %p106_p1 = scmp.ne.s32.totalorder %s699_s14, %s695_s13 }
   0x9   : > { %p107_p2 = scmp.eq.s32.totalorder %s711_s17, 0  ;;  %p112_p3 = scmp.ne.s32.totalorder %s695_s13, %s691_s12 }
   0xa   : > { %s947_s20 = smov (%p40_p0, %s38_s20), 0  ;;  %p113_p5 = scmp.eq.s32.totalorder %s488_s18, 0 }
   0xb   : > { %p783_p4 = por %p107_p2, %p106_p1  ;;  %s94_s23 = ssub.s32 %s707_s16, %s947_s20 }
   0xc   : > { %p140_p6 = scmp.eq.s32.totalorder %s488_s18, 1  ;;  %p97_p7 = scmp.eq.s32.totalorder %s94_s23, 0 }
   0xd   : > { %p789_p8 = por %p113_p5, %p112_p3  ;;  %p146_p10 = scmp.eq.s32.totalorder %s489_s19, 1 }
   0xe   : > { %p793_p9 = por %p140_p6, %p106_p1  ;;  %p537_p13 = scmp.lt.s32.totalorder %s711_s17, 2 }
   0xf   : > { %s798_s26 = scalar_select %p97_p7, %s699_s14, %s99_s21  }
  0x10   : > { %s934_s25 = scalar_select %p793_p9, 1, 0 }
  0x11   : > { %p800_p11 = por %p146_p10, %p112_p3  ;;  %s184_s28 = sand.u32 1, %s699_s14  }
  0x12   : > { %s522_s29 = smul.u32 24, %s184_s28  ;;  %p810_p0 = pnand %p537_p13, %p783_p4 }
  0x13   : > { %s935_s27 = scalar_select %p800_p11, 1, 0 }
  0x14   : > { %s523_s30 = smul.u32 384, %s707_s16  ;;  %s188_s8 = scalar_lea.vmem [#allocation2], %s522_s29 }
  0x15   : > { %s196_s9 = sshll.u32 %s188_s8, 4  ;;  %s822_s10 = scalar_lea.sflag [#allocation3], %s184_s28  ;;  %s819_s9 = int_to_ptr.vmem [resolvable:$true] %s196_s9 }
  0x16   : > { %s817_s7 = scalar_lea.hbm %s929_s2, %s523_s30  ;;  %p601_p3 = pneg %p810_p0 }
  0x17   : > { %s599_s11 = scalar_lea.hbm %s817_s7, 384  ;;  %s604_s21 = scalar_lea.hbm %s929_s2, 768 }
  0x18   : > { %p600_p2 = scmp.ne.s32.totalorder %s817_s7, %s599_s11  ;;  %p605_p6 = scmp.lt.u32.totalorder %s817_s7, %s929_s2 }
  0x19   : > { %p606_p7 = scmp.lt.u32.totalorder %s604_s21, %s599_s11  ;;  %p608_p13 = scmp.lt.u32.totalorder %s599_s11, %s817_s7 }
  0x1a   : > { %p602_p4 = pnand %p601_p3, %p600_p2 }
  0x1b   : > { %p607_p10 = por %p606_p7, %p605_p6 }
  0x1c   : > { %p603_p5 = pneg %p602_p4 }
  0x1d   : > { %p609_p12 = por %p608_p13, %p607_p10 }
  0x1f   : > { %p610_p1 = pnand %p609_p12, %p603_p5 }
  0x21   : > { %613 = shalt.err (!%p610_p1)
}
  0x22   : > { %s614_s28 = scalar_lea.vmem %s819_s9, 384  ;;  %s713_s29 = smov [#allocation2]  }
  0x23   : > { %p615_p2 = scmp.ne.s32.totalorder %s819_s9, %s614_s28  ;;  %s619_s30 = sshll.u32 %s713_s29, 4  ;;  %s620_s30 = int_to_ptr.vmem [resolvable:$false] %s619_s30 }
  0x24   : > { %s621_s5 = scalar_lea.vmem %s620_s30, 768  ;;  %p622_p9 = scmp.lt.s32.totalorder %s819_s9, %s620_s30 }
  0x25   : > { %p617_p4 = pnand %p615_p2, %p601_p3  ;;  %p623_p6 = scmp.lt.s32.totalorder %s621_s5, %s614_s28 }
  0x27   : > { %p618_p11 = pneg %p617_p4  ;;  %p624_p7 = por %p623_p6, %p622_p9 }
  0x29   : > { %p625_p10 = pnand %p624_p7, %p618_p11 }
  0x2b   : > { %628 = shalt.err (!%p625_p10)
}
  0x2c   : > { %s714_s6 = smov 64   ;;  %s715_s8 = smov 4  }
  0x2d   : > { %532 = dma.hbm_to_vmem [thread:$0]  (!%p810_p0), %s817_s7, 384, %s819_s9, %s822_s10, %s714_s6, %s714_s6, %s715_s8  }
  0x2e   : > { %p204_p12 = scmp.lt.s32.totalorder %s711_s17, 3  ;;  %p937_p1 = scmp.ge.s32.totalorder %s711_s17, 1 }
  0x30   : > { %p205_p3 = pnand %p937_p1, %p204_p12 }
  0x31   : > { %s854_s11 = sand.u32 (!%p205_p3), 1, %s695_s13  }
  0x32   : > { %208 = sbr.rel (%p205_p3) target bundleno = 302 (0x12e), region = 32  ;;  %s211_s19 = scalar_lea.sflag (!%p205_p3), [#allocation3], %s854_s11 }
  0x33   : > { %s524_s18 = smul.u32 (!%p205_p3), 24, %s854_s11 }
  0x35   : > { %s214_s21 = scalar_lea.vmem (!%p205_p3), [#allocation2], %s524_s18 }
  0x39   : > { %682 = dma.done.wait (%p789_p8), %s211_s19, 384  }
  0x3a   : > { %684 = vsyncadd (%p789_p8), %s211_s19, 4294966912  ;;  %v716_v0 = vmov 0.0   ;;  %vm717_vm0 = vmmov 0   ;;  %v718_v1 = vmov 0   ;;  %v595_v2 = vld [vmem:[%s214_s21] sm:$0xff]   ;;  %v596_v3 = vld [vmem:[%s214_s21 + $0x8] sm:$0xff]  }
  0x3b   : > { %512 = vmatprep.subr.bf16.mxu0 %v716_v0  ;;  %518 = vmatprep.mubr.msk.bf16.mxu0 %vm717_vm0, %v716_v0  ;;  %v269_v4 = vld [vmem:[%s928_s1] sm:$0xff]  ;;  %v597_v5 = vld [vmem:[%s214_s21 + $0x10] sm:$0xff]   ;;  %vm304_vm1 = vcmask 392192   ;;  %s496_s23 = sshll.u32 %s854_s11, 4  ;;  %s507_s30 = sshll.u32 %s703_s15, 8 }
  0x3c   : > { %594 = vset.pattern.permute.xlu0 %v718_v1  ;;  %513 = vmatpush3.bf16.msra.mxu0 %v595_v2  ;;  %v270_v6 = vld [vmem:[%s928_s1 + $0x8] sm:$0xff]  ;;  %v598_v7 = vld [vmem:[%s927_s0] sm:$0xff]   ;;  %s246_s28 = scalar_lea.vmem [#allocation5], %s496_s23  ;;  %s878_s8 = scalar_lea.hbm %s930_s3, %s507_s30 }
  0x3d   : > { %514 = vmatprep.subr.bf16.mxu0 %v716_v0  ;;  %273 = vperm.xlu0 %594, %v269_v4   ;;  %s368_s29 = sshll.u32 %s246_s28, 4  ;;  %s352_s15 = scalar_lea.sflag [#allocation4], %s854_s11  ;;  %s873_s29 = int_to_ptr.vmem [resolvable:$true] %s368_s29 }
  0x3e   : > { %s629_s18 = scalar_lea.vmem %s873_s29, 256  ;;  %p938_p9 = scmp.ne.s32.totalorder %s934_s25, 0 }
  0x3f   : > { %p630_p8 = scmp.ne.s32.totalorder %s873_s29, %s629_s18  ;;  %s719_s19 = smov [#allocation5]  }
  0x40   : > { %515 = vmatpush3.bf16.msra.mxu0 %v596_v3  ;;  %s633_s21 = sshll.u32 %s719_s19, 4  ;;  %s634_s21 = int_to_ptr.vmem [resolvable:$false] %s633_s21 }
  0x41   : > { %516 = vmatprep.subr.bf16.mxu0 %v716_v0  ;;  %278 = vperm.xlu0 %594, %v270_v6   ;;  %p631_p11 = pnand %p630_p8, %p938_p9  ;;  %s635_s4 = scalar_lea.vmem %s634_s21, 512 }
  0x42   : > { %p636_p5 = scmp.lt.s32.totalorder %s873_s29, %s634_s21  ;;  %p637_p13 = scmp.lt.s32.totalorder %s635_s4, %s629_s18 }
  0x43   : > { %p632_p0 = pneg %p631_p11 }
  0x44   : > { %517 = vmatpush3.bf16.msra.mxu0 %v597_v5  ;;  %p638_p2 = por %p637_p13, %p636_p5 }
  0x46   : > { %p639_p4 = pnand %p638_p2, %p632_p0 }
  0x47   : > { %519 = vmatmul.mubr.msk.bf16.vlgmr.msra.gmra.mrb[0].mxu0 %vm304_vm1, %v598_v7 }
  0xbc   : > { %v274_v8 = vpop.permute.xlu0 %273 }
  0xc0   : > { %v279_v12 = vpop.permute.xlu0 %278 }
 0x11a   : > { %v342_v9 = vpop.f32.mrb[0].mxu0 }
 0x11b   : > { %v343_v10 = vadd.f32 %v342_v9, %v274_v8  ;;  %v520_v11 = vpop.f32.mrb[1].mxu0 }
 0x11c   : > { %v345_v13 = vpop.f32.mrb[2].mxu0 }
 0x11d   : > { %349 = vst [vmem:[%s246_s28] sm:$0xff] %v343_v10  ;;  %v346_v14 = vadd.f32 %v345_v13, %v279_v12  ;;  %v521_v15 = vpop.f32.mrb[3].mxu0 }
 0x11f   : > { %350 = vst [vmem:[%s246_s28 + $0x8] sm:$0xff] %v346_v14 }
 0x120   : > { %642 = shalt.err (!%p639_p4)
}
 0x121   : > { %s643_s7 = scalar_lea.hbm %s878_s8, 256  ;;  %s647_s10 = scalar_lea.hbm %s930_s3, 512 }
 0x122   : > { %p644_p6 = scmp.ne.s32.totalorder %s878_s8, %s643_s7  ;;  %p648_p12 = scmp.lt.u32.totalorder %s878_s8, %s930_s3 }
 0x123   : > { %p649_p1 = scmp.lt.u32.totalorder %s647_s10, %s643_s7  ;;  %p651_p8 = scmp.lt.u32.totalorder %s643_s7, %s878_s8 }
 0x124   : > { %p645_p7 = pnand %p644_p6, %p938_p9 }
 0x125   : > { %p650_p3 = por %p649_p1, %p648_p12 }
 0x126   : > { %p646_p10 = pneg %p645_p7 }
 0x127   : > { %p652_p11 = por %p651_p8, %p650_p3 }
 0x129   : > { %p653_p0 = pnand %p652_p11, %p646_p10 }
 0x12b   : > { %656 = shalt.err (!%p653_p0)
}
 0x12c   : > { %s720_s28 = smov 128   ;;  %s721_s30 = smov 8  }
 0x12d   : > { %527 = dma.vmem_to_hbm [thread:$0]  (%p938_p9), %s873_s29, 256, %s878_s8, %s352_s15, %s720_s28, %s720_s28, %s721_s30  }
 0x12e PF: > { %s383_s5 = sand.u32 1, %s691_s12   ;;  %p939_p5 = scmp.ne.s32.totalorder %s935_s27, 0 }
 0x12f   : > { %p940_p13 = scmp.ge.s32.totalorder %s711_s17, 2  ;;  %s384_s6 = scalar_lea.sflag [#allocation4], %s383_s5 }
 0x131   : > { %p534_p2 = pnand %p940_p13, %p939_p5 }
 0x133   : > { %686 = dma.done.wait (!%p534_p2), %s384_s6, 256  }
 0x134   : > { %688 = vsyncadd (!%p534_p2), %s384_s6, 4294967040  ;;  %s19_s17 = sadd.s32 1, %s711_s17   ;;  %s941_s12 = smov %s695_s13 }
 0x135   : > { %p16_p4 = scmp.ge.s32.totalorder %s19_s17, 4   ;;  %s942_s13 = smov %s699_s14 }
 0x136   : > { %s943_s14 = smov %s798_s26  ;;  %s944_s15 = smov %s707_s16 }
 0x137   : > { %s945_s16 = smov %s947_s20  ;;  %18 = sbr.rel (!%p16_p4) target bundleno = 6 (0x6), region = 83 }
 0x13e   :  { %389 = vsyncpa [#allocation3], 1 }
 0x13f   :  { %391 = vsyncpa [#allocation3 + $0x1], 1 }
 0x140   :  { %392 = vsyncpa [#allocation4], 1 }
 0x141   :  { %394 = vsyncpa [#allocation4 + $0x1], 1 }

</bundles_post_ra>
